<compile_context>
chip_gen: v6e
topology: v6e:2x2x1
jax: 0.10.0
libtpu: 0.0.40
codegen_flags: <defaults>
</compile_context>

<pallas_src>
import math
import functools

import jax
import jax.numpy as jnp
from jax.experimental import pallas as pl
from jax.experimental.pallas import tpu as pltpu

# ---- ModelArgs analogue (small, deterministic) ------------------------------
DIM = 32            # args.dim
N_HEADS = 4         # args.n_heads
N_KV_HEADS = 2      # args.n_kv_heads
HEAD_DIM = DIM // N_HEADS          # 8
N_REP = N_HEADS // N_KV_HEADS      # 2
MAX_BATCH = 2       # args.max_batch_size
MAX_SEQ = 16        # args.max_seq_len
SCALE = 1.0 / math.sqrt(HEAD_DIM)

KV_DIM = N_KV_HEADS * HEAD_DIM           # 16 (flattened kv-head row width)
N_ROT_SLOTS = N_HEADS + N_KV_HEADS       # 6  roped slots (q heads + k heads)
ROT_COLS = N_ROT_SLOTS * HEAD_DIM        # 48
QKV_COLS = (N_HEADS + 2 * N_KV_HEADS) * HEAD_DIM   # 64  (q | k | v)
FUSED_COLS = QKV_COLS + ROT_COLS         # 112 (q | k | v | rot_q | rot_k)


# ---- fused kernel ------------------------------------------------------------
def _fused_attn_kernel(x_ref, w_qkv_ref, w_o_ref, cos_ref, sin_ref,
                       ck_in_ref, cv_in_ref,
                       y_ref, ck_out_ref, cv_out_ref,
                       k_new_ref, v_new_ref, k_old_ref, v_old_ref, sem,
                       *, seq, start_pos):
    """One grid step = one batch element.

    x_ref    : (S, DIM)                                   VMEM block
    w_qkv_ref: (DIM, FUSED_COLS)  packed [Wq | Wk | Wv | rot(Wq) | rot(Wk)]
    w_o_ref  : (N_HEADS*HEAD_DIM, DIM)  = w_o.T
    cos_ref/sin_ref : (S, HEAD_DIM)  pair-duplicated rotary tables
    ck_*/cv_*: (MAX_BATCH, MAX_SEQ, KV_DIM) HBM refs (pl.ANY), aliased in/out
    y_ref    : (S, DIM)
    k_new/v_new : (S, KV_DIM) VMEM scratch (staging for the cache write DMA)
    k_old/v_old : (start_pos, KV_DIM) VMEM scratch (old cache rows)
    """
    b = pl.program_id(0)

    # --- prefetch ONLY the old cache rows this batch needs (issued early) ----
    if start_pos > 0:
        k_rd = pltpu.make_async_copy(ck_in_ref.at[b, pl.ds(0, start_pos)],
                                     k_old_ref, sem.at[0])
        v_rd = pltpu.make_async_copy(cv_in_ref.at[b, pl.ds(0, start_pos)],
                                     v_old_ref, sem.at[1])
        k_rd.start()
        v_rd.start()

    x = x_ref[...]                        # (S, DIM)
    cos = cos_ref[...]                    # (S, HEAD_DIM)
    sin = sin_ref[...]

    # --- ONE fused QKV(+rotated QK) projection --------------------------------
    # columns of proj: [ q0..q3 | k0 k1 | v0 v1 | rq0..rq3 | rk0 rk1 ]
    proj = jnp.dot(x, w_qkv_ref[...], preferred_element_type=jnp.float32)  # (S,112)
    cos_w = jnp.concatenate([cos] * N_ROT_SLOTS, axis=1)    # (S, 48)
    sin_w = jnp.concatenate([sin] * N_ROT_SLOTS, axis=1)
    # RoPE folded into the weights: roped = (x@W)*cos + (x@rot(W))*sin
    qk = proj[:, :ROT_COLS] * cos_w + proj[:, QKV_COLS:] * sin_w   # (S,48) q|k roped
    v_all = proj[:, ROT_COLS:QKV_COLS]                             # (S, KV_DIM)
    k_all = qk[:, N_HEADS * HEAD_DIM:]                             # (S, KV_DIM)

    # --- write ONLY the S new rows back to the HBM cache (in place) -----------
    k_new_ref[...] = k_all
    v_new_ref[...] = v_all
    k_wr = pltpu.make_async_copy(k_new_ref,
                                 ck_out_ref.at[b, pl.ds(start_pos, seq)],
                                 sem.at[2])
    v_wr = pltpu.make_async_copy(v_new_ref,
                                 cv_out_ref.at[b, pl.ds(start_pos, seq)],
                                 sem.at[3])
    k_wr.start()
    v_wr.start()

    if start_pos > 0:
        k_rd.wait()
        v_rd.wait()

    # --- GQA attention: ONE merged (N_REP*S) chain per kv head ----------------
    o_heads = [None] * N_HEADS
    for g in range(N_KV_HEADS):
        k_new_g = k_all[:, g * HEAD_DIM:(g + 1) * HEAD_DIM]        # (S, HD)
        v_new_g = v_all[:, g * HEAD_DIM:(g + 1) * HEAD_DIM]
        if start_pos > 0:
            keys = jnp.concatenate(
                [k_old_ref[:, g * HEAD_DIM:(g + 1) * HEAD_DIM], k_new_g], axis=0)
            vals = jnp.concatenate(
                [v_old_ref[:, g * HEAD_DIM:(g + 1) * HEAD_DIM], v_new_g], axis=0)
        else:
            keys, vals = k_new_g, v_new_g                           # (kv_len, HD)
        # stack the n_rep query heads sharing this kv head -> (N_REP*S, HD)
        q_g = jnp.concatenate(
            [qk[:, h * HEAD_DIM:(h + 1) * HEAD_DIM]
             for h in range(g * N_REP, (g + 1) * N_REP)], axis=0)
        # contract last dims directly -> no explicit K transpose
        scores = jax.lax.dot_general(
            q_g, keys, (((1,), (1,)), ((), ())),
            preferred_element_type=jnp.float32) * SCALE            # (N_REP*S, kv_len)
        # NOTE: no causal mask -- matches the reference module forward.
        m = jnp.max(scores, axis=-1, keepdims=True)
        e = jnp.exp(scores - m)
        p = e * pl.reciprocal(jnp.sum(e, axis=-1, keepdims=True), approx=False)
        o_g = jnp.dot(p, vals, preferred_element_type=jnp.float32)  # (N_REP*S, HD)
        for r in range(N_REP):
            o_heads[g * N_REP + r] = o_g[r * seq:(r + 1) * seq, :]

    # --- ONE fused output projection per batch ---------------------------------
    o_slab = jnp.concatenate(o_heads, axis=1)          # (S, N_HEADS*HEAD_DIM)
    y = jnp.dot(o_slab, w_o_ref[...], preferred_element_type=jnp.float32)
    y_ref[...] = y.astype(y_ref.dtype)

    # cache write DMAs must complete before this grid step finishes
    k_wr.wait()
    v_wr.wait()


# ---- one-time weight packing --------------------------------------------------
def _rotate_pair_cols(wt):
    """wt: (DIM, n) with interleaved (real, imag) column pairs.
    Column-rotated copy: col 2i -> -col 2i+1, col 2i+1 -> col 2i, so RoPE
    becomes  roped = (x@wt)*cos + (x@rot(wt))*sin  (pure FMA)."""
    wr = wt[:, 0::2]
    wi = wt[:, 1::2]
    return jnp.stack([-wi, wr], axis=-1).reshape(wt.shape)


def build_fused_weights(w_q, w_k, w_v, w_o):
    """Pack the four nn.Linear weights (torch (out, in) layout) ONCE at init
    into a single fused QKV(+rotated) operand and the transposed w_o."""
    wq_t, wk_t, wv_t = w_q.T, w_k.T, w_v.T
    w_qkv = jnp.concatenate(
        [wq_t, wk_t, wv_t, _rotate_pair_cols(wq_t), _rotate_pair_cols(wk_t)],
        axis=1)                                    # (DIM, 112)
    return w_qkv, w_o.T                            # (DIM,112), (N_HEADS*HD, DIM)


def build_rope_tables(cos, sin):
    """cos/sin: (S, HEAD_DIM//2) -> (S, HEAD_DIM) pair-duplicated tables
    (position only -- broadcast over batch happens via the grid)."""
    return jnp.repeat(cos, 2, axis=1), jnp.repeat(sin, 2, axis=1)


# ---- wrapper ------------------------------------------------------------------
def self_attention_forward(x, start_pos, cos, sin, w_qkv, w_o_t,
                           cache_k, cache_v):
    """x: (B, S, DIM); cache_k/v: (MAX_BATCH, MAX_SEQ, N_KV_HEADS*HEAD_DIM)
    (byte-identical to the PyTorch (B, T, H, D) buffer).  start_pos is a
    static Python int, as in the PyTorch module."""
    B, S, _ = x.shape
    x2d = x.reshape(B * S, DIM)
    cos_t, sin_t = build_rope_tables(cos, sin)
    kv_len = start_pos + S
    old_rows = max(start_pos, 1)

    kernel = functools.partial(_fused_attn_kernel, seq=S, start_pos=start_pos)

    flops = int(B * (2 * S * DIM * FUSED_COLS
                     + N_KV_HEADS * 2 * 2 * (N_REP * S) * kv_len * HEAD_DIM
                     + 2 * S * DIM * DIM))
    transcendentals = int(B * N_HEADS * S * kv_len)
    bytes_accessed = int(4 * (2 * B * S * DIM + DIM * FUSED_COLS + DIM * DIM
                              + 2 * S * HEAD_DIM
                              + 2 * B * KV_DIM * (start_pos + S)))

    y2d, new_ck, new_cv = pl.pallas_call(
        kernel,
        grid=(B,),
        in_specs=[
            pl.BlockSpec((S, DIM), lambda b: (b, 0)),            # x (per batch)
            pl.BlockSpec((DIM, FUSED_COLS), lambda b: (0, 0)),   # fused QKV W
            pl.BlockSpec((N_HEADS * HEAD_DIM, DIM), lambda b: (0, 0)),  # w_o^T
            pl.BlockSpec((S, HEAD_DIM), lambda b: (0, 0)),       # cos
            pl.BlockSpec((S, HEAD_DIM), lambda b: (0, 0)),       # sin
            pl.BlockSpec(memory_space=pl.ANY),                   # cache_k (HBM)
            pl.BlockSpec(memory_space=pl.ANY),                   # cache_v (HBM)
        ],
        out_specs=(
            pl.BlockSpec((S, DIM), lambda b: (b, 0)),
            pl.BlockSpec(memory_space=pl.ANY),
            pl.BlockSpec(memory_space=pl.ANY),
        ),
        out_shape=(
            jax.ShapeDtypeStruct((B * S, DIM), x.dtype),
            jax.ShapeDtypeStruct(cache_k.shape, cache_k.dtype),
            jax.ShapeDtypeStruct(cache_v.shape, cache_v.dtype),
        ),
        scratch_shapes=[
            pltpu.VMEM((S, KV_DIM), jnp.float32),         # new K rows (staging)
            pltpu.VMEM((S, KV_DIM), jnp.float32),         # new V rows (staging)
            pltpu.VMEM((old_rows, KV_DIM), jnp.float32),  # old K rows
            pltpu.VMEM((old_rows, KV_DIM), jnp.float32),  # old V rows
            pltpu.SemaphoreType.DMA((4,)),
        ],
        # caches updated in place: only the S new rows per batch are written,
        # everything else keeps the aliased input's contents.
        input_output_aliases={5: 1, 6: 2},
        compiler_params=pltpu.CompilerParams(
            dimension_semantics=("parallel",)),
        cost_estimate=pl.CostEstimate(flops=flops,
                                      transcendentals=transcendentals,
                                      bytes_accessed=bytes_accessed),
    )(x2d, w_qkv, w_o_t, cos_t, sin_t, cache_k, cache_v)

    return y2d.reshape(B, S, DIM), new_ck, new_cv


# ---- pure-JAX reference (PyTorch op order / layout), correctness check only ----
def _rope_ref(x, cos, sin):
    """x: (B, S, H, D) interleaved pairs; cos/sin: (S, D//2)."""
    xr = x[..., 0::2]
    xi = x[..., 1::2]
    c = cos[None, :, None, :]
    s = sin[None, :, None, :]
    out_r = xr * c - xi * s
    out_i = xr * s + xi * c
    return jnp.stack([out_r, out_i], axis=-1).reshape(x.shape).astype(x.dtype)


def _ref_forward(params, x, start_pos, cos, sin, cache_k, cache_v):
    B, S, _ = x.shape
    xq = (x @ params["w_q"].T).reshape(B, S, N_HEADS, HEAD_DIM)
    xk = (x @ params["w_k"].T).reshape(B, S, N_KV_HEADS, HEAD_DIM)
    xv = (x @ params["w_v"].T).reshape(B, S, N_KV_HEADS, HEAD_DIM)
    xq = _rope_ref(xq, cos, sin)
    xk = _rope_ref(xk, cos, sin)
    cache_k = cache_k.at[:B, start_pos:start_pos + S].set(xk)
    cache_v = cache_v.at[:B, start_pos:start_pos + S].set(xv)
    kv_len = start_pos + S
    keys = jnp.repeat(cache_k[:B, :kv_len], N_REP, axis=2)
    values = jnp.repeat(cache_v[:B, :kv_len], N_REP, axis=2)
    q = jnp.transpose(xq, (0, 2, 1, 3))
    k = jnp.transpose(keys, (0, 2, 1, 3))
    v = jnp.transpose(values, (0, 2, 1, 3))
    scores = jnp.einsum("bhqd,bhkd->bhqk", q, k) / math.sqrt(HEAD_DIM)
    p = jax.nn.softmax(scores, axis=-1)
    out = jnp.einsum("bhqk,bhkd->bhqd", p, v)
    out = jnp.transpose(out, (0, 2, 1, 3)).reshape(B, S, -1)
    return out @ params["w_o"].T, cache_k, cache_v


# ---- main ----------------------------------------------------------------------
if __name__ == "__main__":
    key = jax.random.PRNGKey(0)
    k1, k2, k3, k4, k5, k6, k7 = jax.random.split(key, 7)

    # nn.Linear weights: (out_features, in_features), bias=False
    params = {
        "w_q": jax.random.normal(k1, (N_HEADS * HEAD_DIM, DIM), jnp.float32) * 0.1,
        "w_k": jax.random.normal(k2, (N_KV_HEADS * HEAD_DIM, DIM), jnp.float32) * 0.1,
        "w_v": jax.random.normal(k3, (N_KV_HEADS * HEAD_DIM, DIM), jnp.float32) * 0.1,
        "w_o": jax.random.normal(k4, (DIM, N_HEADS * HEAD_DIM), jnp.float32) * 0.1,
    }

    B, S = 2, 8
    start_pos = 4
    x = jax.random.normal(k5, (B, S, DIM), jnp.float32)

    # freqs_complex analogue: LLaMA rotary angles for positions
    # [start_pos, start_pos + S)
    theta = 10000.0
    inv_freq = 1.0 / (theta ** (jnp.arange(0, HEAD_DIM, 2, dtype=jnp.float32)
                                / HEAD_DIM))
    t = jnp.arange(start_pos, start_pos + S, dtype=jnp.float32)
    angles = jnp.outer(t, inv_freq)              # (S, HEAD_DIM // 2)
    cos, sin = jnp.cos(angles), jnp.sin(angles)

    # one-time packing of the four nn.Linear weights (amortised over calls)
    w_qkv, w_o_t = build_fused_weights(params["w_q"], params["w_k"],
                                       params["w_v"], params["w_o"])

    # KV cache (module state) in the PyTorch layout with (head, head_dim)
    # flattened: (MAX_BATCH, MAX_SEQ, N_KV_HEADS*HEAD_DIM).  Pre-fill rows
    # [0, start_pos) with nonzero values to exercise the old-row read path and
    # the in-place (aliased) update of untouched rows.
    cache_k0 = jax.random.normal(k6, (MAX_BATCH, MAX_SEQ, KV_DIM), jnp.float32) * 0.1
    cache_v0 = jax.random.normal(k7, (MAX_BATCH, MAX_SEQ, KV_DIM), jnp.float32) * 0.1

    # reference first (functional, PyTorch (B, T, H, D) cache view)
    y_ref, ref_ck, ref_cv = _ref_forward(
        params, x, start_pos, cos, sin,
        cache_k0.reshape(MAX_BATCH, MAX_SEQ, N_KV_HEADS, HEAD_DIM),
        cache_v0.reshape(MAX_BATCH, MAX_SEQ, N_KV_HEADS, HEAD_DIM))

    y, new_ck, new_cv = self_attention_forward(
        x, start_pos, cos, sin, w_qkv, w_o_t, cache_k0, cache_v0)
    y = jax.block_until_ready(y)

    assert y.shape == (B, S, DIM)
    # Tolerance reflects MXU f32 matmul rounding differences between XLA
    # (reference) and Mosaic (kernel) at default precision, not kernel error.
    assert jnp.allclose(y, y_ref, atol=1e-2, rtol=1e-2), \
        "output mismatch vs reference"
    assert jnp.allclose(new_ck.reshape(MAX_BATCH, MAX_SEQ, N_KV_HEADS, HEAD_DIM),
                        ref_ck, atol=1e-2, rtol=1e-2), \
        "cache_k mismatch vs reference"
    assert jnp.allclose(new_cv.reshape(MAX_BATCH, MAX_SEQ, N_KV_HEADS, HEAD_DIM),
                        ref_cv, atol=1e-2, rtol=1e-2), \
        "cache_v mismatch vs reference"

    print("KERNEL_OK")
</pallas_src>

<mosaic_0001>
module attributes {stable_mosaic.version = 11 : i64} {
  func.func @_fused_attn_kernel(%arg0: i32, %arg1: memref<8x32xf32, #tpu.memory_space<vmem>>, %arg2: memref<32x112xf32, #tpu.memory_space<vmem>>, %arg3: memref<32x32xf32, #tpu.memory_space<vmem>>, %arg4: memref<8x8xf32, #tpu.memory_space<vmem>>, %arg5: memref<8x8xf32, #tpu.memory_space<vmem>>, %arg6: memref<2x16x16xf32, #tpu.memory_space<any>>, %arg7: memref<2x16x16xf32, #tpu.memory_space<any>>, %arg8: memref<8x32xf32, #tpu.memory_space<vmem>>, %arg9: memref<2x16x16xf32, #tpu.memory_space<any>>, %arg10: memref<2x16x16xf32, #tpu.memory_space<any>>, %arg11: memref<8x16xf32, #tpu.memory_space<vmem>>, %arg12: memref<8x16xf32, #tpu.memory_space<vmem>>, %arg13: memref<4x16xf32, #tpu.memory_space<vmem>>, %arg14: memref<4x16xf32, #tpu.memory_space<vmem>>, %arg15: memref<4x!tpu.dma_semaphore, #tpu.memory_space<semaphore_mem>>) attributes {dimension_semantics = [#tpu.dimension_semantics<parallel>], iteration_bounds = array<i64: 2>, scalar_prefetch = 0 : i64, scratch_operands = 5 : i64, tpu.core_type = #tpu.core_type<tc>, window_params = [{transform_indices = @transform_0, window_bounds = array<i64: 8, 32>}, {pipeline_mode = #tpu.pipeline_mode<synchronous>, transform_indices = @transform_1, window_bounds = array<i64: 32, 112>}, {pipeline_mode = #tpu.pipeline_mode<synchronous>, transform_indices = @transform_2, window_bounds = array<i64: 32, 32>}, {pipeline_mode = #tpu.pipeline_mode<synchronous>, transform_indices = @transform_3, window_bounds = array<i64: 8, 8>}, {pipeline_mode = #tpu.pipeline_mode<synchronous>, transform_indices = @transform_4, window_bounds = array<i64: 8, 8>}, {}, {}, {transform_indices = @transform_7, window_bounds = array<i64: 8, 32>}, {}, {}]} {
    %c0_i32 = arith.constant 0 : i32
    %c0_i32_0 = arith.constant 0 : i32
    %c0_i32_1 = arith.constant 0 : i32
    %0 = tpu.memref_slice %arg6[%arg0, %c0_i32_0, %c0_i32_1] : memref<2x16x16xf32, #tpu.memory_space<any>> -> memref<1x4x16xf32, #tpu.memory_space<any>>
    %1 = tpu.memref_squeeze %0 : memref<1x4x16xf32, #tpu.memory_space<any>> -> memref<4x16xf32, #tpu.memory_space<any>>
    %2 = tpu.memref_slice %arg15[%c0_i32] : memref<4x!tpu.dma_semaphore, #tpu.memory_space<semaphore_mem>> -> memref<1x!tpu.dma_semaphore, #tpu.memory_space<semaphore_mem>>
    %3 = tpu.memref_squeeze %2 : memref<1x!tpu.dma_semaphore, #tpu.memory_space<semaphore_mem>> -> memref<!tpu.dma_semaphore, #tpu.memory_space<semaphore_mem>>
    tpu.enqueue_dma source(%1 : memref<4x16xf32, #tpu.memory_space<any>>) target(%arg13 : memref<4x16xf32, #tpu.memory_space<vmem>>) target_semaphore(%3 : memref<!tpu.dma_semaphore, #tpu.memory_space<semaphore_mem>>)
    %c1_i32 = arith.constant 1 : i32
    %c0_i32_2 = arith.constant 0 : i32
    %c0_i32_3 = arith.constant 0 : i32
    %4 = tpu.memref_slice %arg7[%arg0, %c0_i32_2, %c0_i32_3] : memref<2x16x16xf32, #tpu.memory_space<any>> -> memref<1x4x16xf32, #tpu.memory_space<any>>
    %5 = tpu.memref_squeeze %4 : memref<1x4x16xf32, #tpu.memory_space<any>> -> memref<4x16xf32, #tpu.memory_space<any>>
    %6 = tpu.memref_slice %arg15[%c1_i32] : memref<4x!tpu.dma_semaphore, #tpu.memory_space<semaphore_mem>> -> memref<1x!tpu.dma_semaphore, #tpu.memory_space<semaphore_mem>>
    %7 = tpu.memref_squeeze %6 : memref<1x!tpu.dma_semaphore, #tpu.memory_space<semaphore_mem>> -> memref<!tpu.dma_semaphore, #tpu.memory_space<semaphore_mem>>
    tpu.enqueue_dma source(%5 : memref<4x16xf32, #tpu.memory_space<any>>) target(%arg14 : memref<4x16xf32, #tpu.memory_space<vmem>>) target_semaphore(%7 : memref<!tpu.dma_semaphore, #tpu.memory_space<semaphore_mem>>)
    %c0 = arith.constant 0 : index
    %c0_4 = arith.constant 0 : index
    %8 = vector.load %arg1[%c0, %c0_4] : memref<8x32xf32, #tpu.memory_space<vmem>>, vector<8x32xf32>
    %c0_5 = arith.constant 0 : index
    %c0_6 = arith.constant 0 : index
    %9 = vector.load %arg4[%c0_5, %c0_6] : memref<8x8xf32, #tpu.memory_space<vmem>>, vector<8x8xf32>
    %c0_7 = arith.constant 0 : index
    %c0_8 = arith.constant 0 : index
    %10 = vector.load %arg5[%c0_7, %c0_8] : memref<8x8xf32, #tpu.memory_space<vmem>>, vector<8x8xf32>
    %c0_9 = arith.constant 0 : index
    %c0_10 = arith.constant 0 : index
    %11 = vector.load %arg2[%c0_9, %c0_10] : memref<32x112xf32, #tpu.memory_space<vmem>>, vector<32x112xf32>
    %cst = arith.constant dense<0.000000e+00> : vector<8x112xf32>
    %12 = tpu.matmul %8, %11, %cst {dimension_numbers = #tpu.dot_dimension_numbers<[1], [0], [0], [1], [0, 0, 1, 1], [], []>} : vector<8x32xf32>, vector<32x112xf32>, vector<8x112xf32> -> vector<8x112xf32>
    %13 = tpu.concatenate %9, %9, %9, %9, %9, %9 in 1 : vector<8x8xf32>, vector<8x8xf32>, vector<8x8xf32>, vector<8x8xf32>, vector<8x8xf32>, vector<8x8xf32> -> vector<8x48xf32>
    %14 = tpu.concatenate %10, %10, %10, %10, %10, %10 in 1 : vector<8x8xf32>, vector<8x8xf32>, vector<8x8xf32>, vector<8x8xf32>, vector<8x8xf32>, vector<8x8xf32> -> vector<8x48xf32>
    %15 = vector.extract_strided_slice %12 {offsets = [0, 0], sizes = [8, 48], strides = [1, 1]} : vector<8x112xf32> to vector<8x48xf32>
    %16 = arith.mulf %15, %13 : vector<8x48xf32>
    %17 = vector.extract_strided_slice %12 {offsets = [0, 64], sizes = [8, 48], strides = [1, 1]} : vector<8x112xf32> to vector<8x48xf32>
    %18 = arith.mulf %17, %14 : vector<8x48xf32>
    %19 = arith.addf %16, %18 : vector<8x48xf32>
    %20 = vector.extract_strided_slice %12 {offsets = [0, 48], sizes = [8, 16], strides = [1, 1]} : vector<8x112xf32> to vector<8x16xf32>
    %21 = vector.extract_strided_slice %19 {offsets = [0, 32], sizes = [8, 16], strides = [1, 1]} : vector<8x48xf32> to vector<8x16xf32>
    %c0_11 = arith.constant 0 : index
    %c0_12 = arith.constant 0 : index
    %22 = vector.load %arg11[%c0_11, %c0_12] : memref<8x16xf32, #tpu.memory_space<vmem>>, vector<8x16xf32>
    tpu.vector_store %arg11[%c0_11, %c0_12], %21 {strides = array<i32>} : memref<8x16xf32, #tpu.memory_space<vmem>>, vector<8x16xf32>,
    %c0_13 = arith.constant 0 : index
    %c0_14 = arith.constant 0 : index
    %23 = vector.load %arg12[%c0_13, %c0_14] : memref<8x16xf32, #tpu.memory_space<vmem>>, vector<8x16xf32>
    tpu.vector_store %arg12[%c0_13, %c0_14], %20 {strides = array<i32>} : memref<8x16xf32, #tpu.memory_space<vmem>>, vector<8x16xf32>,
    %c2_i32 = arith.constant 2 : i32
    %c4_i32 = arith.constant 4 : i32
    %c0_i32_15 = arith.constant 0 : i32
    %24 = tpu.memref_slice %arg9[%arg0, %c4_i32, %c0_i32_15] : memref<2x16x16xf32, #tpu.memory_space<any>> -> memref<1x8x16xf32, #tpu.memory_space<any>>
    %25 = tpu.memref_squeeze %24 : memref<1x8x16xf32, #tpu.memory_space<any>> -> memref<8x16xf32, #tpu.memory_space<any>>
    %26 = tpu.memref_slice %arg15[%c2_i32] : memref<4x!tpu.dma_semaphore, #tpu.memory_space<semaphore_mem>> -> memref<1x!tpu.dma_semaphore, #tpu.memory_space<semaphore_mem>>
    %27 = tpu.memref_squeeze %26 : memref<1x!tpu.dma_semaphore, #tpu.memory_space<semaphore_mem>> -> memref<!tpu.dma_semaphore, #tpu.memory_space<semaphore_mem>>
    tpu.enqueue_dma source(%arg11 : memref<8x16xf32, #tpu.memory_space<vmem>>) target(%25 : memref<8x16xf32, #tpu.memory_space<any>>) target_semaphore(%27 : memref<!tpu.dma_semaphore, #tpu.memory_space<semaphore_mem>>)
    %c3_i32 = arith.constant 3 : i32
    %c4_i32_16 = arith.constant 4 : i32
    %c0_i32_17 = arith.constant 0 : i32
    %28 = tpu.memref_slice %arg10[%arg0, %c4_i32_16, %c0_i32_17] : memref<2x16x16xf32, #tpu.memory_space<any>> -> memref<1x8x16xf32, #tpu.memory_space<any>>
    %29 = tpu.memref_squeeze %28 : memref<1x8x16xf32, #tpu.memory_space<any>> -> memref<8x16xf32, #tpu.memory_space<any>>
    %30 = tpu.memref_slice %arg15[%c3_i32] : memref<4x!tpu.dma_semaphore, #tpu.memory_space<semaphore_mem>> -> memref<1x!tpu.dma_semaphore, #tpu.memory_space<semaphore_mem>>
    %31 = tpu.memref_squeeze %30 : memref<1x!tpu.dma_semaphore, #tpu.memory_space<semaphore_mem>> -> memref<!tpu.dma_semaphore, #tpu.memory_space<semaphore_mem>>
    tpu.enqueue_dma source(%arg12 : memref<8x16xf32, #tpu.memory_space<vmem>>) target(%29 : memref<8x16xf32, #tpu.memory_space<any>>) target_semaphore(%31 : memref<!tpu.dma_semaphore, #tpu.memory_space<semaphore_mem>>)
    %c0_i32_18 = arith.constant 0 : i32
    %c0_i32_19 = arith.constant 0 : i32
    %c0_i32_20 = arith.constant 0 : i32
    %32 = tpu.memref_slice %arg6[%arg0, %c0_i32_19, %c0_i32_20] : memref<2x16x16xf32, #tpu.memory_space<any>> -> memref<1x4x16xf32, #tpu.memory_space<any>>
    %33 = tpu.memref_squeeze %32 : memref<1x4x16xf32, #tpu.memory_space<any>> -> memref<4x16xf32, #tpu.memory_space<any>>
    %34 = tpu.memref_slice %arg15[%c0_i32_18] : memref<4x!tpu.dma_semaphore, #tpu.memory_space<semaphore_mem>> -> memref<1x!tpu.dma_semaphore, #tpu.memory_space<semaphore_mem>>
    %35 = tpu.memref_squeeze %34 : memref<1x!tpu.dma_semaphore, #tpu.memory_space<semaphore_mem>> -> memref<!tpu.dma_semaphore, #tpu.memory_space<semaphore_mem>>
    tpu.wait_dma2 semaphore(%35 : memref<!tpu.dma_semaphore, #tpu.memory_space<semaphore_mem>>) src(%33 : memref<4x16xf32, #tpu.memory_space<any>>) dst(%arg13 : memref<4x16xf32, #tpu.memory_space<vmem>>)
    %c1_i32_21 = arith.constant 1 : i32
    %c0_i32_22 = arith.constant 0 : i32
    %c0_i32_23 = arith.constant 0 : i32
    %36 = tpu.memref_slice %arg7[%arg0, %c0_i32_22, %c0_i32_23] : memref<2x16x16xf32, #tpu.memory_space<any>> -> memref<1x4x16xf32, #tpu.memory_space<any>>
    %37 = tpu.memref_squeeze %36 : memref<1x4x16xf32, #tpu.memory_space<any>> -> memref<4x16xf32, #tpu.memory_space<any>>
    %38 = tpu.memref_slice %arg15[%c1_i32_21] : memref<4x!tpu.dma_semaphore, #tpu.memory_space<semaphore_mem>> -> memref<1x!tpu.dma_semaphore, #tpu.memory_space<semaphore_mem>>
    %39 = tpu.memref_squeeze %38 : memref<1x!tpu.dma_semaphore, #tpu.memory_space<semaphore_mem>> -> memref<!tpu.dma_semaphore, #tpu.memory_space<semaphore_mem>>
    tpu.wait_dma2 semaphore(%39 : memref<!tpu.dma_semaphore, #tpu.memory_space<semaphore_mem>>) src(%37 : memref<4x16xf32, #tpu.memory_space<any>>) dst(%arg14 : memref<4x16xf32, #tpu.memory_space<vmem>>)
    %40 = vector.extract_strided_slice %21 {offsets = [0, 0], sizes = [8, 8], strides = [1, 1]} : vector<8x16xf32> to vector<8x8xf32>
    %41 = vector.extract_strided_slice %20 {offsets = [0, 0], sizes = [8, 8], strides = [1, 1]} : vector<8x16xf32> to vector<8x8xf32>
    %c0_24 = arith.constant 0 : index
    %c0_25 = arith.constant 0 : index
    %42 = vector.load %arg13[%c0_24, %c0_25] : memref<4x16xf32, #tpu.memory_space<vmem>>, vector<4x8xf32>
    %43 = tpu.concatenate %42, %40 in 0 : vector<4x8xf32>, vector<8x8xf32> -> vector<12x8xf32>
    %c0_26 = arith.constant 0 : index
    %c0_27 = arith.constant 0 : index
    %44 = vector.load %arg14[%c0_26, %c0_27] : memref<4x16xf32, #tpu.memory_space<vmem>>, vector<4x8xf32>
    %45 = tpu.concatenate %44, %41 in 0 : vector<4x8xf32>, vector<8x8xf32> -> vector<12x8xf32>
    %46 = vector.extract_strided_slice %19 {offsets = [0, 0], sizes = [8, 8], strides = [1, 1]} : vector<8x48xf32> to vector<8x8xf32>
    %47 = vector.extract_strided_slice %19 {offsets = [0, 8], sizes = [8, 8], strides = [1, 1]} : vector<8x48xf32> to vector<8x8xf32>
    %48 = tpu.concatenate %46, %47 in 0 : vector<8x8xf32>, vector<8x8xf32> -> vector<16x8xf32>
    %cst_28 = arith.constant dense<0.000000e+00> : vector<16x12xf32>
    %49 = tpu.matmul %48, %43, %cst_28 {dimension_numbers = #tpu.dot_dimension_numbers<[1], [1], [0], [0], [0, 0, 1, 0], [], []>} : vector<16x8xf32>, vector<12x8xf32>, vector<16x12xf32> -> vector<16x12xf32>
    %cst_29 = arith.constant 0.353553385 : f32
    %50 = vector.broadcast %cst_29 : f32 to vector<16x12xf32>
    %51 = arith.mulf %49, %50 : vector<16x12xf32>
    %cst_30 = arith.constant dense<0xFF800000> : vector<16xf32>
    %52 = vector.multi_reduction <maximumf>, %51, %cst_30 [1] : vector<16x12xf32> to vector<16xf32>
    %53 = vector.shape_cast %52 : vector<16xf32> to vector<16x1xf32>
    %54 = vector.broadcast %53 : vector<16x1xf32> to vector<16x12xf32>
    %55 = arith.subf %51, %54 : vector<16x12xf32>
    %56 = math.exp %55 : vector<16x12xf32>
    %cst_31 = arith.constant dense<0.000000e+00> : vector<16xf32>
    %57 = vector.multi_reduction <add>, %56, %cst_31 [1] : vector<16x12xf32> to vector<16xf32>
    %58 = vector.shape_cast %57 : vector<16xf32> to vector<16x1xf32>
    %59 = tpu.reciprocal %58 : vector<16x1xf32> -> vector<16x1xf32>
    %60 = vector.broadcast %59 : vector<16x1xf32> to vector<16x12xf32>
    %61 = arith.mulf %56, %60 : vector<16x12xf32>
    %cst_32 = arith.constant dense<0.000000e+00> : vector<16x8xf32>
    %62 = tpu.matmul %61, %45, %cst_32 {dimension_numbers = #tpu.dot_dimension_numbers<[1], [0], [0], [1], [0, 0, 1, 1], [], []>} : vector<16x12xf32>, vector<12x8xf32>, vector<16x8xf32> -> vector<16x8xf32>
    %63 = vector.extract_strided_slice %62 {offsets = [0, 0], sizes = [8, 8], strides = [1, 1]} : vector<16x8xf32> to vector<8x8xf32>
    %64 = vector.extract_strided_slice %62 {offsets = [8, 0], sizes = [8, 8], strides = [1, 1]} : vector<16x8xf32> to vector<8x8xf32>
    %65 = vector.extract_strided_slice %21 {offsets = [0, 8], sizes = [8, 8], strides = [1, 1]} : vector<8x16xf32> to vector<8x8xf32>
    %66 = vector.extract_strided_slice %20 {offsets = [0, 8], sizes = [8, 8], strides = [1, 1]} : vector<8x16xf32> to vector<8x8xf32>
    %c0_33 = arith.constant 0 : index
    %c8 = arith.constant 8 : index
    %67 = vector.load %arg13[%c0_33, %c8] : memref<4x16xf32, #tpu.memory_space<vmem>>, vector<4x8xf32>
    %68 = tpu.concatenate %67, %65 in 0 : vector<4x8xf32>, vector<8x8xf32> -> vector<12x8xf32>
    %c0_34 = arith.constant 0 : index
    %c8_35 = arith.constant 8 : index
    %69 = vector.load %arg14[%c0_34, %c8_35] : memref<4x16xf32, #tpu.memory_space<vmem>>, vector<4x8xf32>
    %70 = tpu.concatenate %69, %66 in 0 : vector<4x8xf32>, vector<8x8xf32> -> vector<12x8xf32>
    %71 = vector.extract_strided_slice %19 {offsets = [0, 16], sizes = [8, 8], strides = [1, 1]} : vector<8x48xf32> to vector<8x8xf32>
    %72 = vector.extract_strided_slice %19 {offsets = [0, 24], sizes = [8, 8], strides = [1, 1]} : vector<8x48xf32> to vector<8x8xf32>
    %73 = tpu.concatenate %71, %72 in 0 : vector<8x8xf32>, vector<8x8xf32> -> vector<16x8xf32>
    %cst_36 = arith.constant dense<0.000000e+00> : vector<16x12xf32>
    %74 = tpu.matmul %73, %68, %cst_36 {dimension_numbers = #tpu.dot_dimension_numbers<[1], [1], [0], [0], [0, 0, 1, 0], [], []>} : vector<16x8xf32>, vector<12x8xf32>, vector<16x12xf32> -> vector<16x12xf32>
    %cst_37 = arith.constant 0.353553385 : f32
    %75 = vector.broadcast %cst_37 : f32 to vector<16x12xf32>
    %76 = arith.mulf %74, %75 : vector<16x12xf32>
    %cst_38 = arith.constant dense<0xFF800000> : vector<16xf32>
    %77 = vector.multi_reduction <maximumf>, %76, %cst_38 [1] : vector<16x12xf32> to vector<16xf32>
    %78 = vector.shape_cast %77 : vector<16xf32> to vector<16x1xf32>
    %79 = vector.broadcast %78 : vector<16x1xf32> to vector<16x12xf32>
    %80 = arith.subf %76, %79 : vector<16x12xf32>
    %81 = math.exp %80 : vector<16x12xf32>
    %cst_39 = arith.constant dense<0.000000e+00> : vector<16xf32>
    %82 = vector.multi_reduction <add>, %81, %cst_39 [1] : vector<16x12xf32> to vector<16xf32>
    %83 = vector.shape_cast %82 : vector<16xf32> to vector<16x1xf32>
    %84 = tpu.reciprocal %83 : vector<16x1xf32> -> vector<16x1xf32>
    %85 = vector.broadcast %84 : vector<16x1xf32> to vector<16x12xf32>
    %86 = arith.mulf %81, %85 : vector<16x12xf32>
    %cst_40 = arith.constant dense<0.000000e+00> : vector<16x8xf32>
    %87 = tpu.matmul %86, %70, %cst_40 {dimension_numbers = #tpu.dot_dimension_numbers<[1], [0], [0], [1], [0, 0, 1, 1], [], []>} : vector<16x12xf32>, vector<12x8xf32>, vector<16x8xf32> -> vector<16x8xf32>
    %88 = vector.extract_strided_slice %87 {offsets = [0, 0], sizes = [8, 8], strides = [1, 1]} : vector<16x8xf32> to vector<8x8xf32>
    %89 = vector.extract_strided_slice %87 {offsets = [8, 0], sizes = [8, 8], strides = [1, 1]} : vector<16x8xf32> to vector<8x8xf32>
    %90 = tpu.concatenate %63, %64, %88, %89 in 1 : vector<8x8xf32>, vector<8x8xf32>, vector<8x8xf32>, vector<8x8xf32> -> vector<8x32xf32>
    %c0_41 = arith.constant 0 : index
    %c0_42 = arith.constant 0 : index
    %91 = vector.load %arg3[%c0_41, %c0_42] : memref<32x32xf32, #tpu.memory_space<vmem>>, vector<32x32xf32>
    %cst_43 = arith.constant dense<0.000000e+00> : vector<8x32xf32>
    %92 = tpu.matmul %90, %91, %cst_43 {dimension_numbers = #tpu.dot_dimension_numbers<[1], [0], [0], [1], [0, 0, 1, 1], [], []>} : vector<8x32xf32>, vector<32x32xf32>, vector<8x32xf32> -> vector<8x32xf32>
    %c0_44 = arith.constant 0 : index
    %c0_45 = arith.constant 0 : index
    %93 = vector.load %arg8[%c0_44, %c0_45] : memref<8x32xf32, #tpu.memory_space<vmem>>, vector<8x32xf32>
    tpu.vector_store %arg8[%c0_44, %c0_45], %92 {strides = array<i32>} : memref<8x32xf32, #tpu.memory_space<vmem>>, vector<8x32xf32>,
    %c2_i32_46 = arith.constant 2 : i32
    %c4_i32_47 = arith.constant 4 : i32
    %c0_i32_48 = arith.constant 0 : i32
    %94 = tpu.memref_slice %arg9[%arg0, %c4_i32_47, %c0_i32_48] : memref<2x16x16xf32, #tpu.memory_space<any>> -> memref<1x8x16xf32, #tpu.memory_space<any>>
    %95 = tpu.memref_squeeze %94 : memref<1x8x16xf32, #tpu.memory_space<any>> -> memref<8x16xf32, #tpu.memory_space<any>>
    %96 = tpu.memref_slice %arg15[%c2_i32_46] : memref<4x!tpu.dma_semaphore, #tpu.memory_space<semaphore_mem>> -> memref<1x!tpu.dma_semaphore, #tpu.memory_space<semaphore_mem>>
    %97 = tpu.memref_squeeze %96 : memref<1x!tpu.dma_semaphore, #tpu.memory_space<semaphore_mem>> -> memref<!tpu.dma_semaphore, #tpu.memory_space<semaphore_mem>>
    tpu.wait_dma2 semaphore(%97 : memref<!tpu.dma_semaphore, #tpu.memory_space<semaphore_mem>>) src(%arg11 : memref<8x16xf32, #tpu.memory_space<vmem>>) dst(%95 : memref<8x16xf32, #tpu.memory_space<any>>)
    %c3_i32_49 = arith.constant 3 : i32
    %c4_i32_50 = arith.constant 4 : i32
    %c0_i32_51 = arith.constant 0 : i32
    %98 = tpu.memref_slice %arg10[%arg0, %c4_i32_50, %c0_i32_51] : memref<2x16x16xf32, #tpu.memory_space<any>> -> memref<1x8x16xf32, #tpu.memory_space<any>>
    %99 = tpu.memref_squeeze %98 : memref<1x8x16xf32, #tpu.memory_space<any>> -> memref<8x16xf32, #tpu.memory_space<any>>
    %100 = tpu.memref_slice %arg15[%c3_i32_49] : memref<4x!tpu.dma_semaphore, #tpu.memory_space<semaphore_mem>> -> memref<1x!tpu.dma_semaphore, #tpu.memory_space<semaphore_mem>>
    %101 = tpu.memref_squeeze %100 : memref<1x!tpu.dma_semaphore, #tpu.memory_space<semaphore_mem>> -> memref<!tpu.dma_semaphore, #tpu.memory_space<semaphore_mem>>
    tpu.wait_dma2 semaphore(%101 : memref<!tpu.dma_semaphore, #tpu.memory_space<semaphore_mem>>) src(%arg12 : memref<8x16xf32, #tpu.memory_space<vmem>>) dst(%99 : memref<8x16xf32, #tpu.memory_space<any>>)
    return
  }
  func.func @transform_0(%arg0: i32) -> (i32, i32) {
    %c0_i32 = arith.constant 0 : i32
    %c0_i32_0 = arith.constant 0 : i32
    return %arg0, %c0_i32 : i32, i32
  }
  func.func @transform_1(%arg0: i32) -> (i32, i32) {
    %c0_i32 = arith.constant 0 : i32
    %c0_i32_0 = arith.constant 0 : i32
    %c0_i32_1 = arith.constant 0 : i32
    return %c0_i32, %c0_i32_0 : i32, i32
  }
  func.func @transform_2(%arg0: i32) -> (i32, i32) {
    %c0_i32 = arith.constant 0 : i32
    %c0_i32_0 = arith.constant 0 : i32
    %c0_i32_1 = arith.constant 0 : i32
    return %c0_i32, %c0_i32_0 : i32, i32
  }
  func.func @transform_3(%arg0: i32) -> (i32, i32) {
    %c0_i32 = arith.constant 0 : i32
    %c0_i32_0 = arith.constant 0 : i32
    %c0_i32_1 = arith.constant 0 : i32
    return %c0_i32, %c0_i32_0 : i32, i32
  }
  func.func @transform_4(%arg0: i32) -> (i32, i32) {
    %c0_i32 = arith.constant 0 : i32
    %c0_i32_0 = arith.constant 0 : i32
    %c0_i32_1 = arith.constant 0 : i32
    return %c0_i32, %c0_i32_0 : i32, i32
  }
  func.func @transform_7(%arg0: i32) -> (i32, i32) {
    %c0_i32 = arith.constant 0 : i32
    %c0_i32_0 = arith.constant 0 : i32
    return %arg0, %c0_i32 : i32, i32
  }
}

</mosaic_0001>

<bundles_post_ra>
// kernel: tpu_custom_call.1
= control target key start
LH: loop header
LB: loop body
LE: loop exit
PB: predicated region body
PF: predicated region fallthrough
CT: control target
= control target key end

     0   :  { %s1753_s0 = inlined_call_operand.vmem [shape: f32[16,32], index: 0, kind: input, shape index: {}]   ;;  %s1754_s1 = inlined_call_operand.vmem [shape: f32[32,112], index: 1, kind: input, shape index: {}]   ;;  %s1755_s2 = inlined_call_operand.vmem [shape: f32[32,32], index: 2, kind: input, shape index: {}]   ;;  %s1756_s3 = inlined_call_operand.vmem [shape: f32[8,8], index: 3, kind: input, shape index: {}]   ;;  %s1757_s4 = inlined_call_operand.vmem [shape: f32[8,8], index: 4, kind: input, shape index: {}]   ;;  %s1758_s5 = inlined_call_operand.hbm [shape: f32[2,16,16], index: 5, kind: input, shape index: {}, may-alias: {5,8}]   ;;  %s1759_s6 = inlined_call_operand.hbm [shape: f32[2,16,16], index: 6, kind: input, shape index: {}, may-alias: {6,9}]   ;;  %s1760_s7 = inlined_call_operand.hbm [shape: f32[16,32], index: 7, kind: output, shape index: {0}]   ;;  %s1761_s8 = inlined_call_operand.hbm [shape: f32[2,16,16], index: 8, kind: output, shape index: {1}, may-alias: {5,8}]   ;;  %s1762_s9 = inlined_call_operand.hbm [shape: f32[2,16,16], index: 9, kind: output, shape index: {2}, may-alias: {6,9}]  }
   0x1   :  { %1772 = sst [smem:[#allocation24_spill]] %s1753_s0 }
   0x2   :  { %1773 = sst [smem:[#allocation25_spill]] %s1754_s1 }
   0x3   :  { %1774 = sst [smem:[#allocation26_spill]] %s1756_s3 }
   0x4   :  { %15 = vsyncpa [#allocation8], 0 }
   0x5   :  { %17 = vsyncpa [#allocation8 + $0x1], 0  ;;  %s1471_s30 = smov 0   ;;  %s1473_s10 = smov 0  }
   0x6   :  { %s1475_s11 = smov 0   ;;  %s1477_s12 = smov 0  }
   0x7 LB: > { %s1492_s13 = sadd.s32 4294967295, %s1402_s12   ;;  %s1056_s14 = sadd.s32 4294967294, %s1402_s12   ;;  %s1402_s12 = sphi %s1477_s12, %s1791_s12   ;;  %s1398_s11 = sphi %s1475_s11, %s1790_s11   ;;  %s1394_s10 = sphi %s1473_s10, %s1789_s10   ;;  %s1390_s30 = sphi %s1471_s30, %s1788_s30  }
   0x8   : > { %s1496_s15 = sadd.s32 1, %s1402_s12   ;;  %s140_s16 = sadd.s32 1, %s1398_s11 }
   0x9   : > { %s137_s17 = ssub.s32 %s1402_s12, %s1496_s15  ;;  %p150_p0 = scmp.ne.s32.totalorder %s1398_s11, %s1394_s10 }
   0xa   : > { %p138_p1 = scmp.eq.s32.totalorder %s137_s17, 0  ;;  %p151_p2 = scmp.eq.s32.totalorder %s1492_s13, 1 }
   0xb   : > { %p156_p3 = scmp.ne.s32.totalorder %s1394_s10, %s1390_s30  ;;  %p157_p4 = scmp.eq.s32.totalorder %s1056_s14, 1 }
   0xc   : > { %s1507_s18 = scalar_select %p138_p1, %s1398_s11, %s140_s16  }
   0xd   : > { %p1509_p5 = por %p151_p2, %p150_p0  ;;  %p1513_p6 = por %p157_p4, %p156_p3 }
   0xe   : > { %p1059_p7 = scmp.ge.s32.totalorder %s1402_s12, 1  ;;  %p194_p8 = scmp.lt.s32.totalorder %s1402_s12, 3 }
  0x10   : > { %p195_p9 = pnand %p1059_p7, %p194_p8 }
  0x11   : > { %s1777_s1 = sld [smem:[#allocation25_spill]] (!%p195_p9)  ;;  %s1766_s25 = smov (!%p195_p9), 8  }
  0x12   : > { %198 = sbr.rel (%p195_p9) target bundleno = 2225 (0x8b1), region = 40  ;;  %s1763_s26 = smov (!%p195_p9), 24  }
  0x13   : > { %p221_p10 = scmp.lt.s32.totalorder (!%p195_p9), %s1492_s13, 1  ;;  %s1767_s14 = smov (!%p195_p9), 16  }
  0x14   : > { %s1765_s16 = smov (!%p195_p9), 32   ;;  %s1778_s0 = sld [smem:[#allocation24_spill]] (!%p195_p9) }
  0x15   : > { %s1779_s3 = sld [smem:[#allocation26_spill]] (!%p195_p9)  ;;  %s1780_s21 = smov (!%p195_p9), 24  }
  0x16   : > { %s1567_s23 = sshll.u32 (!%p195_p9), %s1492_s13, 8 }
  0x17   : > { %v255_v0 = vld [vmem:[%s1757_s4] sm:$0xff]  ;;  %v259_v1 = vld [vmem:[%s1777_s1 + $0x18] sm:$0xff]  ;;  %v1406_v2 = vmov 0.0   ;;  %vm1407_vm0 = vmmov 0   ;;  %v258_v3 = vld [vmem:[%s1777_s1 + $0x10] sm:$0xff]  ;;  %s222_s29 = scalar_select %p221_p10, %s1492_s13, 1 }
  0x18   : > { %360 = vrot.lane.b32.xlu0 %v255_v0, %s1766_s25  ;;  %366 = vrot.lane.b32.xlu1 %v255_v0, %s1763_s26  ;;  %v257_v4 = vld [vmem:[%s1777_s1 + $0x8] sm:$0xff]  ;;  %v256_v5 = vld [vmem:[%s1777_s1] sm:$0xff]  ;;  %vm260_vm1 = vcmask 261120   ;;  %vm350_vm2 = vcmask 64512   ;;  %vm352_vm3 = vcmask 130048   ;;  %vm354_vm4 = vcmask 195584   ;;  %s227_s17 = scalar_lea.hbm %s1758_s5, %s1567_s23 }
  0x19   : > { %1123 = vmatprep.subr.mxu0 %v1406_v2  ;;  %1131 = vmatprep.mubr.msk.f32.mxu0 %vm1407_vm0, %v1406_v2  ;;  %s1061_s22 = sshll.u32 %s222_s29, 3  ;;  %vm357_vm5 = vcmask 326656   ;;  %s1412_s29 = smov [#allocation4]  }
  0x1a   : > { %1124 = vmatpush3.msra.mxu0 %v259_v1  ;;  %s224_s26 = scalar_lea.vmem %s1778_s0, %s1061_s22  ;;  %s1769_s22 = sand.u32 1, %s1394_s10  }
  0x1b   : > { %1125 = vmatprep.subr.mxu0 %v1406_v2  ;;  %v253_v6 = vld [vmem:[%s224_s26] sm:$0xff]  ;;  %s1768_s26 = smov 64   ;;  %s1571_s24 = sshll.u32 %s1769_s22, 3 }
  0x1c   : > { %363 = vrot.lane.b32.xlu0 %v255_v0, %s1767_s14  ;;  %369 = vrot.lane.b32.xlu1 %v255_v0, %s1765_s16  ;;  %s1410_s16 = smov 40   ;;  %v254_v7 = vld [vmem:[%s1779_s3] sm:$0xff]  ;;  %s1246_s0 = scalar_lea.hbm %s1758_s5, 512 }
  0x1d   : > { %1126 = vmatpush3.msra.mxu0 %v258_v3  ;;  %p1247_p12 = scmp.lt.s32.totalorder %s227_s17, %s1758_s5 }
  0x1e   : > { %1127 = vmatprep.subr.mxu0 %v1406_v2 }
  0x1f   : > { %1128 = vmatpush3.msra.mxu0 %v257_v4 }
  0x20   : > { %372 = vrot.lane.b32.xlu0 %v255_v0, %s1410_s16  ;;  %1129 = vmatprep.subr.mxu0 %v1406_v2 }
  0x21   : > { %1130 = vmatpush3.msra.mxu0 %v256_v5 }
  0x22   : > { %1132 = vmatmul.mubr.msk.f32.vlgmr.msra.gmra.mxu0 %vm260_vm1, %v253_v6 }
  0x24   : > { %335 = vrot.lane.b32.xlu0 %v254_v7, %s1766_s25  ;;  %s235_s25 = sshll.u32 %s1412_s29, 4  ;;  %s236_s25 = int_to_ptr.vmem [resolvable:$true] %s235_s25 }
  0x28   : > { %341 = vrot.lane.b32.xlu0 %v254_v7, %s1780_s21 }
  0x2c   : > { %347 = vrot.lane.b32.xlu0 %v254_v7, %s1410_s16  ;;  %s1781_s16 = smov 32  }
  0x8a   : > { %v361_v8 = vpop.permute.xlu0 %360  ;;  %v367_v9 = vpop.permute.xlu1 %366 }
  0x8b   : > { %v375_v10 = vsel %vm350_vm2, %v255_v0, %v361_v8 }
  0x8e   : > { %v364_v11 = vpop.permute.xlu0 %363  ;;  %v370_v12 = vpop.permute.xlu1 %369 }
  0x8f   : > { %v376_v13 = vsel %vm352_vm3, %v375_v10, %v364_v11 }
  0x90   : > { %v377_v14 = vsel %vm354_vm4, %v376_v13, %v367_v9 }
  0x91   : > { %v378_v15 = vsel %vm260_vm1, %v377_v14, %v370_v12 }
  0x92   : > { %v373_v16 = vpop.permute.xlu0 %372 }
  0x93   : > { %v379_v17 = vsel %vm357_vm5, %v378_v15, %v373_v16 }
  0x94   : > { %382 = vrot.lane.b32.xlu1 %v379_v17, %s1768_s26 }
  0x96   : > { %v336_v20 = vpop.permute.xlu0 %335 }
  0x98   : > { %338 = vrot.lane.b32.xlu1 %v254_v7, %s1767_s14  ;;  %s1244_s14 = scalar_lea.hbm %s227_s17, 64 }
  0x99   : > { %p1245_p11 = scmp.ne.s32.totalorder %s227_s17, %s1244_s14  ;;  %p1248_p13 = scmp.lt.s32.totalorder %s1246_s0, %s1244_s14 }
  0x9b   : > { %p1249_p0 = por %p1248_p13, %p1247_p12 }
  0x9c   : > { %344 = vrot.lane.b32.xlu1 %v254_v7, %s1781_s16 }
  0x9d   : > { %p1250_p1 = pnand %p1249_p0, %p1245_p11 }
  0xe2   : > { %v1563_v18 = vpop.f32.mrf.mxu0 }
  0xe4   : > { %v1133_v19 = vpop.f32.mrf.mxu0 }
  0xe5   : > { %1253 = shalt.err (!%p1250_p1)  }
  0xe6   : > { %s1254_s22 = scalar_lea.vmem %s236_s25, 64  ;;  %p1259_p3 = scmp.lt.s32.totalorder %s236_s25, %s236_s25 }
  0xe7   : > { %p1255_p2 = scmp.ne.s32.totalorder %s236_s25, %s1254_s22  ;;  %p1260_p4 = scmp.lt.s32.totalorder %s1254_s22, %s1254_s22 }
  0xe9   : > { %p1261_p7 = por %p1260_p4, %p1259_p3 }
  0xeb   : > { %p1262_p8 = pnand %p1261_p7, %p1255_p2 }
  0xed   : > { %1265 = shalt.err (!%p1262_p8)  }
  0xee   : > { %238 = dma.hbm_to_vmem [thread:$0]  %s227_s17, 64, %s236_s25, [#allocation6]  ;;  %v342_v23 = vpop.permute.xlu0 %341  ;;  %v351_v24 = vsel %vm350_vm2, %v254_v7, %v336_v20 }
  0xef   : > { %s1782_s1 = smov 64   ;;  %s1770_s0 = smov 80  }
  0xf0   : > { %s1414_s3 = smov [#allocation5]   ;;  %s240_s22 = scalar_lea.hbm %s1759_s6, %s1567_s23 }
  0xf1   : > { %s249_s25 = sshll.u32 %s1414_s3, 4  ;;  %s1266_s27 = scalar_lea.hbm %s240_s22, 64  ;;  %s250_s25 = int_to_ptr.vmem [resolvable:$true] %s249_s25 }
  0xf2   : > { %v348_v28 = vpop.permute.xlu0 %347  ;;  %p1267_p9 = scmp.ne.s32.totalorder %s240_s22, %s1266_s27  ;;  %s1268_s29 = scalar_lea.hbm %s1759_s6, 512 }
  0xf3   : > { %p1269_p10 = scmp.lt.s32.totalorder %s240_s22, %s1759_s6  ;;  %p1270_p11 = scmp.lt.s32.totalorder %s1268_s29, %s1266_s27 }
  0xf5   : > { %p1271_p12 = por %p1270_p11, %p1269_p10 }
  0xf7   : > { %p1272_p13 = pnand %p1271_p12, %p1267_p9 }
 0x106   : > { %v383_v21 = vpop.permute.xlu1 %382 }
 0x107   : > { %v385_v22 = vmul.f32 %v383_v21, %v1563_v18 }
 0x109   : > { %387 = vrot.lane.b32.xlu1 %v385_v22, %s1782_s1 }
 0x10a   : > { %v339_v25 = vpop.permute.xlu1 %338 }
 0x10b   : > { %v353_v26 = vsel %vm352_vm3, %v351_v24, %v339_v25 }
 0x10c   : > { %v355_v27 = vsel %vm354_vm4, %v353_v26, %v342_v23 }
 0x10d   : > { %397 = vrot.lane.b32.xlu1 %v1563_v18, %s1770_s0 }
 0x10e   : > { %v345_v29 = vpop.permute.xlu1 %344 }
 0x10f   : > { %v356_v30 = vsel %vm260_vm1, %v355_v27, %v345_v29 }
 0x110   : > { %v358_v31 = vsel %vm357_vm5, %v356_v30, %v348_v28 }
 0x111   : > { %v380_v32 = vmul.f32 %v358_v31, %v1563_v18 }
 0x112   : > { %1275 = shalt.err (!%p1272_p13)  }
 0x113   : > { %s1276_s3 = scalar_lea.vmem %s250_s25, 64  ;;  %p1281_p1 = scmp.lt.s32.totalorder %s250_s25, %s250_s25 }
 0x114   : > { %p1277_p0 = scmp.ne.s32.totalorder %s250_s25, %s1276_s3  ;;  %p1282_p2 = scmp.lt.s32.totalorder %s1276_s3, %s1276_s3 }
 0x116   : > { %p1283_p3 = por %p1282_p2, %p1281_p1 }
 0x118   : > { %p1284_p4 = pnand %p1283_p3, %p1277_p0 }
 0x11a   : > { %1287 = shalt.err (!%p1284_p4)  }
 0x11b   : > { %252 = dma.hbm_to_vmem [thread:$0]  %s240_s22, 64, %s250_s25, [#allocation6 + $0x1] }
 0x11c   : > { %s1771_s14 = smov 96   ;;  %s1021_s28 = scalar_lea.hbm %s1761_s8, %s1567_s23 }
 0x11d   : > { %s1416_s17 = smov [#allocation2]   ;;  %s1616_s22 = scalar_lea.hbm %s1762_s9, %s1567_s23 }
 0x11e   : > { %s412_s29 = sshll.u32 %s1416_s17, 4  ;;  %s1417_s1 = smov [#allocation3]   ;;  %s413_s29 = int_to_ptr.vmem [resolvable:$true] %s412_s29 }
 0x11f   : > { %s426_s3 = sshll.u32 %s1417_s1, 4  ;;  %s1022_s0 = scalar_lea.hbm %s1021_s28, 64  ;;  %s1621_s3 = int_to_ptr.vmem [resolvable:$true] %s426_s3 }
 0x120   : > { %s1288_s26 = scalar_lea.vmem %s413_s29, 128  ;;  %p1293_p8 = scmp.lt.s32.totalorder %s413_s29, %s413_s29 }
 0x121   : > { %p1289_p7 = scmp.ne.s32.totalorder %s413_s29, %s1288_s26  ;;  %p1294_p9 = scmp.lt.s32.totalorder %s1288_s26, %s1288_s26 }
 0x123   : > { %p1295_p10 = por %p1294_p9, %p1293_p8 }
 0x125   : > { %p1296_p11 = pnand %p1295_p10, %p1289_p7 }
 0x17b   : > { %v388_v33 = vpop.permute.xlu1 %387 }
 0x17c   : > { %v1603_v34 = vadd.f32 %v388_v33, %v380_v32 }
 0x17e   : > { %392 = vrot.lane.b32.xlu0 %v1603_v34, %s1771_s14  ;;  %s1619_s14 = scalar_lea.hbm %s1616_s22, 64 }
 0x17f   : > { %v398_v35 = vpop.permute.xlu1 %397 }
 0x180   : > { %400 = vst.msk [vmem:[#allocation3] sm:$0xff] %vm352_vm3, %v398_v35 }
 0x1f0   : > { %v393_v36 = vpop.permute.xlu0 %392 }
 0x1f1   : > { %395 = vst.msk [vmem:[#allocation2] sm:$0xff] %vm352_vm3, %v393_v36 }
 0x1f2   : > { %1299 = shalt.err (!%p1296_p11)  }
 0x1f3   : > { %s1310_s23 = scalar_lea.hbm %s1021_s28, 192  ;;  %s1302_s16 = scalar_lea.hbm %s1761_s8, 512 }
 0x1f4   : > { %p1301_p12 = scmp.ne.s32.totalorder %s1022_s0, %s1310_s23  ;;  %p1303_p13 = scmp.lt.s32.totalorder %s1022_s0, %s1761_s8 }
 0x1f5   : > { %p1304_p0 = scmp.lt.s32.totalorder %s1302_s16, %s1310_s23 }
 0x1f7   : > { %p1305_p1 = por %p1304_p0, %p1303_p13 }
 0x1f9   : > { %p1306_p2 = pnand %p1305_p1, %p1301_p12 }
 0x1fb   : > { %1309 = shalt.err (!%p1306_p2)  }
 0x1fc   : > { %415 = dma.vmem_to_hbm [thread:$0]  %s413_s29, 128, %s1022_s0, [#allocation6 + $0x2] }
 0x1fd   : > { %s1311_s26 = scalar_lea.vmem %s1621_s3, 128  ;;  %p1316_p4 = scmp.lt.s32.totalorder %s1621_s3, %s1621_s3 }
 0x1fe   : > { %p1312_p3 = scmp.ne.s32.totalorder %s1621_s3, %s1311_s26  ;;  %p1317_p7 = scmp.lt.s32.totalorder %s1311_s26, %s1311_s26 }
 0x200   : > { %p1318_p8 = por %p1317_p7, %p1316_p4 }
 0x202   : > { %p1319_p9 = pnand %p1318_p8, %p1312_p3 }
 0x204   : > { %1322 = shalt.err (!%p1319_p9)  }
 0x205   : > { %s1333_s28 = scalar_lea.hbm %s1616_s22, 192  ;;  %s1325_s0 = scalar_lea.hbm %s1762_s9, 512 }
 0x206   : > { %p1324_p10 = scmp.ne.s32.totalorder %s1619_s14, %s1333_s28  ;;  %p1326_p11 = scmp.lt.s32.totalorder %s1619_s14, %s1762_s9 }
 0x207   : > { %p1327_p12 = scmp.lt.s32.totalorder %s1325_s0, %s1333_s28 }
 0x209   : > { %p1328_p13 = por %p1327_p12, %p1326_p11 }
 0x20b   : > { %p1329_p0 = pnand %p1328_p13, %p1324_p10 }
 0x20d   : > { %1332 = shalt.err (!%p1329_p0)  }
 0x20e   : > { %429 = dma.vmem_to_hbm [thread:$0]  %s1621_s3, 128, %s1619_s14, [#allocation6 + $0x3] }
 0x20f   : > { %s220_s16 = scalar_lea.vmem [#allocation7], %s1571_s24 }
 0x210   : > { %1376 = dma.done.wait [#allocation6], 64 }
 0x211   : > { %1377 = vsyncadd [#allocation6], 4294967232  ;;  %v436_v37 = vrot.slane %v1603_v34, 4 }
 0x212   : > { %1378 = dma.done.wait [#allocation6 + $0x1], 64 }
 0x213   : > { %1379 = vsyncadd [#allocation6 + $0x1], 4294967232  ;;  %1138 = vmatprep.mubr.msk.f32.mxu1 %vm350_vm2, %v1603_v34  ;;  %s1783_s22 = smov 96   ;;  %s1418_s25 = smov 120   ;;  %v435_v38 = vld [vmem:[#allocation4] sm:$0xf] }
 0x214   : > { %437 = vrot.lane.b32.xlu0 %v436_v37, %s1783_s22  ;;  %vm440_vm6 = vcmask 1043456   ;;  %vm536_vm7 = vcmask 97280   ;;  %v443_v58 = vrot.slane %v1563_v18, 4  ;;  %s1784_s14 = smov 80   ;;  %s1419_s3 = smov 112   ;;  %v864_v35 = vld [vmem:[%s1755_s2 + $0x18] sm:$0xff] }
 0x215   : > { %v442_v61 = vld [vmem:[#allocation5] sm:$0xf]  ;;  %s1785_s1 = smov 8   ;;  %v862_v37 = vld [vmem:[%s1755_s2 + $0x8] sm:$0xff] }
 0x216   : > { %v863_v36 = vld [vmem:[%s1755_s2 + $0x10] sm:$0xff] }
 0x218   : > { %448 = vrot.lane.b32.xlu0 %v1603_v34, %s1418_s25 }
 0x286   : > { %v438_v39 = vpop.permute.xlu0 %437 }
 0x287   : > { %1134 = vmatprep.subr.msk.mxu1 %vm350_vm2, %v438_v39  ;;  %v441_v40 = vsel %vm440_vm6, %v435_v38, %v438_v39  ;;  %v861_v38 = vld [vmem:[%s1755_s2] sm:$0xff] }
 0x288   : > { %1135 = vmatpush3.xpose.msk.msra.mxu1 %vm350_vm2, %v438_v39 }
 0x289   : > { %1136 = vmatprep.subr.msk.mxu1 %vm350_vm2, %v441_v40 }
 0x28a   : > { %v449_v41 = vpop.permute.xlu0 %448 }
 0x28c   : > { %1137 = vmatpush3.xpose.msk.msra.mxu1 %vm350_vm2, %v441_v40 }
 0x28f   : > { %1139 = vmatmul.mubr.msk.f32.vlgmr.msra.gmra.mxu1 %vm350_vm2, %v449_v41 }
 0x34f   : > { %v1140_v42 = vpop.f32.mrf.mxu1 }
 0x350   : > { %v535_v45 = vmul.f32 0.35355338, %v1140_v42 }
 0x351   : > { %v525_v43 = vpop.f32.mrf.mxu1 }
 0x352   : > { %v534_v44 = vmul.f32 0.35355338, %v525_v43  ;;  %v540_v47 = vsel %vm536_vm7, %v535_v45, -inf }
 0x354   : > { %v537_v46 = vsel %vm536_vm7, %v534_v44, -inf }
 0x355   : > { %538 = vmax.xlane.f32.xlu1 %v537_v46 }
 0x359   : > { %541 = vmax.xlane.f32.xlu1 %v540_v47 }
 0x3de   : > { %v539_v48 = vpop.xlane.xlu1 %538 }
 0x3df   : > { %v543_v49 = vsub.f32 %v534_v44, %v539_v48 }
 0x3e1   : > { %v545_v50 = vmul.f32 1.442695, %v543_v49 }
 0x3e2   : > { %v542_v51 = vpop.xlane.xlu1 %541 }
 0x3e3   : > { %1228 = vpow2.f32 %v545_v50  ;;  %v544_v52 = vsub.f32 %v535_v45, %v542_v51 }
 0x3e5   : > { %v547_v53 = vmul.f32 1.442695, %v544_v52 }
 0x3e7   : > { %1230 = vpow2.f32 %v547_v53 }
 0x3f0   : > { %v1229_v54 = vpop.eup %1228 }
 0x3f1   : > { %v549_v55 = vsel %vm536_vm7, %v1229_v54, 0.0 }
 0x3f2   : > { %550 = vadd.xlane.f32.xlu0 %v549_v55 }
 0x3f4   : > { %v1231_v56 = vpop.eup %1230 }
 0x3f5   : > { %v552_v57 = vsel %vm536_vm7, %v1231_v56, 0.0 }
 0x3f6   : > { %553 = vadd.xlane.f32.xlu1 %v552_v57 }
 0x407   : > { %444 = vrot.lane.b32.xlu1 %v443_v58, %s1784_s14 }
 0x408   : > { %644 = vrot.lane.b32.xlu0 %v449_v41, %s1419_s3 }
 0x40b   : > { %648 = vrot.lane.b32.xlu1 %v438_v39, %s1418_s25 }
 0x40f   : > { %646 = vrot.lane.b32.xlu1 %v441_v40, %s1418_s25 }
 0x413   : > { %642 = vrot.lane.b32.xlu1 %v1603_v34, %s1419_s3 }
 0x47b   : > { %v551_v59 = vpop.xlane.xlu0 %550 }
 0x47c   : > { %1232 = vrcp.f32 %v551_v59 }
 0x47f   : > { %v554_v60 = vpop.xlane.xlu1 %553  ;;  %v645_v8 = vpop.permute.xlu0 %644 }
 0x480   : > { %1234 = vrcp.f32 %v554_v60 }
 0x483   : > { %v445_v62 = vpop.permute.xlu1 %444 }
 0x484   : > { %1141 = vmatprep.subr.msk.mxu1 %vm440_vm6, %v445_v62  ;;  %v447_v63 = vsel %vm440_vm6, %v442_v61, %v445_v62 }
 0x485   : > { %1142 = vmatpush3.msk.msra.mxu1 %vm440_vm6, %v445_v62 }
 0x486   : > { %1143 = vmatprep.subr.mxu1 %v447_v63 }
 0x487   : > { %1144 = vmatpush3.msra.mxu1 %v447_v63  ;;  %v649_v0 = vpop.permute.xlu1 %648 }
 0x488   : > { %1148 = vmatprep.subr.msk.mxu1 %vm350_vm2, %v649_v0 }
 0x489   : > { %v1233_v1 = vpop.eup %1232 }
 0x48a   : > { %v557_v3 = vmul.f32 %v1233_v1, %v1229_v54 }
 0x48b   : > { %v647_v4 = vpop.permute.xlu1 %646 }
 0x48c   : > { %1145 = vmatprep.mubr.msk.f32.mxu1 %vm536_vm7, %v557_v3 }
 0x48d   : > { %v1235_v5 = vpop.eup %1234 }
 0x48e   : > { %v558_v6 = vmul.f32 %v1235_v5, %v1231_v56 }
 0x48f   : > { %v643_v7 = vpop.permute.xlu1 %642 }
 0x490   : > { %1146 = vmatmul.mubr.msk.f32.vlgmr.msra.gmra.mxu1 %vm536_vm7, %v558_v6 }
 0x491   : > { %1149 = vmatpush3.xpose.msk.msra.mxu1 %vm350_vm2, %v649_v0  ;;  %1152 = vmatprep.mubr.msk.f32.mxu1 %vm350_vm2, %v643_v7 }
 0x492   : > { %1150 = vmatprep.subr.msk.mxu1 %vm350_vm2, %v647_v4 }
 0x495   : > { %1151 = vmatpush3.xpose.msk.msra.mxu1 %vm350_vm2, %v647_v4 }
 0x498   : > { %1153 = vmatmul.mubr.msk.f32.vlgmr.msra.gmra.mxu1 %vm350_vm2, %v645_v8 }
 0x550   : > { %v1147_v9 = vpop.f32.mrf.mxu1 }
 0x552   : > { %v633_v10 = vpop.f32.mrf.mxu1 }
 0x558   : > { %v1154_v11 = vpop.f32.mrf.mxu1 }
 0x559   : > { %v734_v12 = vmul.f32 0.35355338, %v1154_v11 }
 0x55a   : > { %v724_v13 = vpop.f32.mrf.mxu1 }
 0x55b   : > { %v733_v14 = vmul.f32 0.35355338, %v724_v13  ;;  %v738_v15 = vsel %vm536_vm7, %v734_v12, -inf }
 0x55c   : > { %739 = vmax.xlane.f32.xlu0 %v738_v15 }
 0x55d   : > { %v735_v16 = vsel %vm536_vm7, %v733_v14, -inf }
 0x55e   : > { %736 = vmax.xlane.f32.xlu1 %v735_v16 }
 0x572   : > { %758 = vrot.lane.b32.xlu0 %v447_v63, %s1418_s25 }
 0x5e5   : > { %v740_v17 = vpop.xlane.xlu0 %739 }
 0x5e6   : > { %v742_v18 = vsub.f32 %v734_v12, %v740_v17 }
 0x5e7   : > { %v737_v19 = vpop.xlane.xlu1 %736 }
 0x5e8   : > { %v745_v20 = vmul.f32 1.442695, %v742_v18  ;;  %v741_v21 = vsub.f32 %v733_v14, %v737_v19 }
 0x5e9   : > { %v759_v30 = vpop.permute.xlu0 %758 }
 0x5ea   : > { %1236 = vpow2.f32 %v745_v20  ;;  %v743_v22 = vmul.f32 1.442695, %v741_v21 }
 0x5ec   : > { %1238 = vpow2.f32 %v743_v22 }
 0x5f7   : > { %v1237_v23 = vpop.eup %1236 }
 0x5f8   : > { %v750_v24 = vsel %vm536_vm7, %v1237_v23, 0.0 }
 0x5f9   : > { %v1239_v25 = vpop.eup %1238  ;;  %751 = vadd.xlane.f32.xlu1 %v750_v24 }
 0x5fa   : > { %v747_v26 = vsel %vm536_vm7, %v1239_v25, 0.0 }
 0x5fd   : > { %748 = vadd.xlane.f32.xlu1 %v747_v26 }
 0x60e   : > { %760 = vrot.lane.b32.xlu1 %v445_v62, %s1418_s25  ;;  %s1786_s25 = smov 16  }
 0x612   : > { %847 = vrot.lane.b32.xlu1 %v1147_v9, %s1785_s1 }
 0x682   : > { %v752_v27 = vpop.xlane.xlu1 %751 }
 0x683   : > { %1240 = vrcp.f32 %v752_v27 }
 0x686   : > { %v749_v28 = vpop.xlane.xlu1 %748 }
 0x687   : > { %1242 = vrcp.f32 %v749_v28 }
 0x68a   : > { %v761_v29 = vpop.permute.xlu1 %760 }
 0x68b   : > { %1155 = vmatprep.subr.msk.mxu0 %vm440_vm6, %v761_v29 }
 0x68c   : > { %1156 = vmatpush3.msk.msra.mxu0 %vm440_vm6, %v761_v29 }
 0x68d   : > { %1157 = vmatprep.subr.mxu0 %v759_v30 }
 0x68e   : > { %1158 = vmatpush3.msra.mxu0 %v759_v30  ;;  %v848_v41 = vpop.permute.xlu1 %847 }
 0x68f   : > { %1162 = vmatprep.subr.mxu0 %v1406_v2  ;;  %v858_v43 = vsel %vm350_vm2, %v633_v10, %v848_v41 }
 0x690   : > { %v1241_v31 = vpop.eup %1240 }
 0x691   : > { %v756_v34 = vmul.f32 %v1241_v31, %v1237_v23 }
 0x694   : > { %v1243_v32 = vpop.eup %1242 }
 0x695   : > { %v755_v33 = vmul.f32 %v1243_v32, %v1239_v25 }
 0x697   : > { %1159 = vmatprep.mubr.msk.f32.mxu0 %vm536_vm7, %v755_v33 }
 0x698   : > { %1160 = vmatmul.mubr.msk.f32.vlgmr.msra.gmra.mxu0 %vm536_vm7, %v756_v34 }
 0x699   : > { %1170 = vmatprep.mubr.msk.f32.mxu0 %vm1407_vm0, %v1406_v2  ;;  %1163 = vmatpush3.msra.mxu0 %v864_v35 }
 0x69a   : > { %1164 = vmatprep.subr.mxu0 %v1406_v2 }
 0x69b   : > { %1165 = vmatpush3.msra.mxu0 %v863_v36 }
 0x69c   : > { %1166 = vmatprep.subr.mxu0 %v1406_v2 }
 0x69d   : > { %1167 = vmatpush3.msra.mxu0 %v862_v37 }
 0x69e   : > { %1168 = vmatprep.subr.mxu0 %v1406_v2 }
 0x69f   : > { %1169 = vmatpush3.msra.mxu0 %v861_v38 }
 0x758   : > { %v1161_v39 = vpop.f32.mrf.mxu0 }
 0x75a   : > { %v837_v40 = vpop.f32.mrf.mxu0 }
 0x75b   : > { %851 = vrot.lane.b32.xlu1 %v837_v40, %s1786_s25 }
 0x75f   : > { %855 = vrot.lane.b32.xlu1 %v1161_v39, %s1780_s21 }
 0x7cd   : > { %v852_v42 = vpop.permute.xlu1 %851 }
 0x7ce   : > { %v859_v44 = vsel %vm352_vm3, %v858_v43, %v852_v42 }
 0x7d1   : > { %v856_v45 = vpop.permute.xlu1 %855 }
 0x7d2   : > { %v860_v2 = vsel %vm354_vm4, %v859_v44, %v856_v45 }
 0x7d3   : > { %1171 = vmatmul.mubr.msk.f32.vlgmr.msra.gmra.mxu0 %vm260_vm1, %v860_v2 }
 0x893   : > { %v934_v46 = vpop.f32.mrf.mxu0 }
 0x894   : > { %938 = vst.msk [vmem:[%s220_s16] sm:$0xff] %vm260_vm1, %v934_v46 }
 0x895   : > { %v1172_v47 = vpop.f32.mrf.mxu0 }
 0x896   : > { %1380 = dma.done.wait [#allocation6 + $0x2], 128 }
 0x897   : > { %1381 = vsyncadd [#allocation6 + $0x2], 4294967168 }
 0x898   : > { %1382 = dma.done.wait [#allocation6 + $0x3], 128 }
 0x899   : > { %1383 = vsyncadd [#allocation6 + $0x3], 4294967168  ;;  %s1086_s21 = sshll.u32 %s1492_s13, 7  ;;  %s958_s26 = sshll.u32 %s220_s16, 4  ;;  %s959_s26 = int_to_ptr.vmem [resolvable:$true] %s958_s26 }
 0x89a   : > { %s956_s1 = scalar_lea.hbm %s1760_s7, %s1086_s21  ;;  %s1787_s28 = sand.u32 1, %s1394_s10  }
 0x89b   : > { %s945_s23 = scalar_lea.sflag [#allocation8], %s1787_s28  ;;  %s1334_s27 = scalar_lea.vmem %s959_s26, 128 }
 0x89c   : > { %p1335_p1 = scmp.ne.s32.totalorder %s959_s26, %s1334_s27  ;;  %s1420_s0 = smov [#allocation7]  }
 0x89d   : > { %s1338_s29 = sshll.u32 %s1420_s0, 4  ;;  %s1339_s29 = int_to_ptr.vmem [resolvable:$false] %s1338_s29 }
 0x89e   : > { %p1336_p2 = pnand %p1335_p1, %p1509_p5  ;;  %s1340_s17 = scalar_lea.vmem %s1339_s29, 256 }
 0x89f   : > { %p1341_p4 = scmp.lt.s32.totalorder %s959_s26, %s1339_s29  ;;  %p1342_p7 = scmp.lt.s32.totalorder %s1340_s17, %s1334_s27 }
 0x8a0   : > { %p1337_p3 = pneg %p1336_p2 }
 0x8a1   : > { %p1343_p8 = por %p1342_p7, %p1341_p4 }
 0x8a3   : > { %p1344_p9 = pnand %p1343_p8, %p1337_p3 }
 0x8a5   : > { %1347 = shalt.err (!%p1344_p9)
}
 0x8a6   : > { %s1348_s13 = scalar_lea.hbm %s956_s1, 128  ;;  %s1352_s22 = scalar_lea.hbm %s1760_s7, 256 }
 0x8a7   : > { %p1349_p10 = scmp.ne.s32.totalorder %s956_s1, %s1348_s13  ;;  %p1353_p13 = scmp.lt.s32.totalorder %s956_s1, %s1760_s7 }
 0x8a8   : > { %p1354_p0 = scmp.lt.s32.totalorder %s1352_s22, %s1348_s13 }
 0x8a9   : > { %p1350_p11 = pnand %p1349_p10, %p1509_p5 }
 0x8aa   : > { %p1355_p1 = por %p1354_p0, %p1353_p13 }
 0x8ab   : > { %p1351_p12 = pneg %p1350_p11 }
 0x8ad   : > { %p1356_p2 = pnand %p1355_p1, %p1351_p12 }
 0x8af   : > { %1359 = shalt.err (!%p1356_p2)
}
 0x8b0   : > { %1173 = dma.vmem_to_hbm [thread:$0]  (%p1509_p5), %s959_s26, 128, %s956_s1, %s945_s23  }
 0x8b1 PF: > { %p1179_p3 = scmp.ge.s32.totalorder %s1402_s12, 2  ;;  %s970_s14 = sand.u32 1, %s1390_s30  }
 0x8b2   : > { %s971_s3 = scalar_lea.sflag [#allocation8], %s970_s14 }
 0x8b3   : > { %p1176_p4 = pnand %p1179_p3, %p1513_p6 }
 0x8b5   : > { %p1177_p7 = pneg %p1176_p4 }
 0x8b7   : > { %1385 = dma.done.wait (%p1177_p7), %s971_s3, 128  }
 0x8b8   : > { %1387 = vsyncadd (%p1177_p7), %s971_s3, 4294967168  ;;  %p20_p8 = scmp.ge.s32.totalorder %s1496_s15, 4   ;;  %s1788_s30 = smov %s1394_s10 }
 0x8b9   : > { %s1789_s10 = smov %s1398_s11  ;;  %s1790_s11 = smov %s1507_s18 }
 0x8ba   : > { %s1791_s12 = smov %s1496_s15  ;;  %22 = sbr.rel (!%p20_p8) target bundleno = 7 (0x7), region = 101 }
 0x8bf   :  { %976 = vsyncpa [#allocation8], 1 }
 0x8c0   :  { %978 = vsyncpa [#allocation8 + $0x1], 1 }
 0x8c1   :  { %979 = vsyncmov [#allocation6] }
 0x8c4   :  { %s980_s12 = vpop.sfrf %979 }
 0x8c5   :  { %p1089_p5 = scmp.ne.s32.totalorder %s980_s12, 0 }
 0x8c7   :  { %984 = shalt.err (%p1089_p5)  }
 0x8c8   :  { %986 = vsyncmov [#allocation6 + $0x1] }
 0x8cb   :  { %s987_s19 = vpop.sfrf %986 }
 0x8cc   :  { %p1090_p6 = scmp.ne.s32.totalorder %s987_s19, 0 }
 0x8ce   :  { %991 = shalt.err (%p1090_p6)  }
 0x8cf   :  { %993 = vsyncmov [#allocation6 + $0x2] }
 0x8d2   :  { %s994_s20 = vpop.sfrf %993 }
 0x8d3   :  { %p1091_p9 = scmp.ne.s32.totalorder %s994_s20, 0 }
 0x8d5   :  { %998 = shalt.err (%p1091_p9)  }
 0x8d6   :  { %1000 = vsyncmov [#allocation6 + $0x3] }
 0x8d9   :  { %s1001_s1 = vpop.sfrf %1000 }
 0x8da   :  { %p1092_p10 = scmp.ne.s32.totalorder %s1001_s1, 0 }
 0x8dc   :  { %1005 = shalt.err (%p1092_p10)  }

</bundles_post_ra>
